<compile_context>
chip_gen: v7x
topology: tpu7x:2x2x1
jax: 0.10.0
libtpu: 0.0.40
codegen_flags: <defaults>
</compile_context>

<pallas_src>
import functools

import jax
import jax.numpy as jnp
from jax import lax
from jax.experimental import pallas as pl
from jax.experimental.pallas import tpu as pltpu


def _silu(x):
    # x * sigmoid(x), kept in f32.  (exp goes to the EUP slot already; the divide is
    # cheap relative to the memory-bound feature stream.)
    return x * (1.0 / (1.0 + jnp.exp(-x)))


def eddp_kernel(nb_ref, x_ref, w1_ref, b1_ref, w2_ref, b2_ref, w3_ref, b3_ref,
                out_ref, acc_ref, cnt_ref):
    """One node tile: MLP up to h2, one-hot scatter into resident accumulators."""
    i = pl.program_id(0)

    @pl.when(i == 0)
    def _init():
        acc_ref[...] = jnp.zeros_like(acc_ref)
        cnt_ref[...] = jnp.zeros_like(cnt_ref)

    # --- MLP (first two layers), bf16 operands, f32 accumulation ---------------
    x = x_ref[...]                                                  # [TN, D_in] bf16
    h1 = jnp.dot(x, w1_ref[...], preferred_element_type=jnp.float32) + b1_ref[...]
    h1 = _silu(h1)                                                  # [TN, H1] f32
    h2 = jnp.dot(h1.astype(jnp.bfloat16), w2_ref[...],
                 preferred_element_type=jnp.float32) + b2_ref[...]
    h2 = _silu(h2)                                                  # [TN, H2] f32

    # --- scatter-sum (one-hot matmul on the MXU) -------------------------------
    g = acc_ref.shape[0]
    tn = x_ref.shape[0]
    nb = nb_ref[...]                                                # [1, TN] int32
    graph_ids = lax.broadcasted_iota(jnp.int32, (g, tn), 0)         # [G, TN]
    mask = (graph_ids == nb).astype(jnp.float32)                    # exact 0/1 mask

    acc_ref[...] += jnp.dot(mask, h2, preferred_element_type=jnp.float32)  # [G, H2]
    cnt_ref[...] += jnp.sum(mask, axis=-1, keepdims=True)                  # [G, 1]

    # --- finalize: apply d_out projection once, bias scaled by node counts -----
    @pl.when(i == pl.num_programs(0) - 1)
    def _finalize():
        e_s = jnp.dot(acc_ref[...], w3_ref[...],
                      preferred_element_type=jnp.float32)           # [G, d_out]
        out_ref[...] = e_s + cnt_ref[...] * b3_ref[...]


def eddp_forward(features, node_batch, num_graphs, params, *, tile_n=128):
    """features: [N, D_in] f32, node_batch: [N] int32 -> e_s: [num_graphs, d_out]."""
    w1, b1, w2, b2, w3, b3 = params
    n, d_in = features.shape
    h2 = w2.shape[1]
    d_out = w3.shape[1]

    # Pad graphs to a multiple of 8 (sublane) and nodes to a multiple of the tile.
    g_pad = max(8, ((num_graphs + 7) // 8) * 8)
    num_tiles = pl.cdiv(n, tile_n)
    n_pad = num_tiles * tile_n

    # bf16 feature stream (halves HBM bytes); padded rows get the out-of-range
    # graph id g_pad so their one-hot column is all zeros.
    feats = jnp.zeros((n_pad, d_in), jnp.bfloat16)
    feats = feats.at[:n].set(features.astype(jnp.bfloat16))
    nb2d = jnp.full((1, n_pad), g_pad, dtype=jnp.int32)
    nb2d = nb2d.at[0, :n].set(node_batch.astype(jnp.int32))

    w1b = w1.astype(jnp.bfloat16)
    w2b = w2.astype(jnp.bfloat16)

    resident = lambda shp: pl.BlockSpec(shp, lambda i: (0, 0))

    out = pl.pallas_call(
        eddp_kernel,
        grid=(num_tiles,),
        in_specs=[
            pl.BlockSpec((1, tile_n), lambda i: (0, i)),        # node_batch tile
            pl.BlockSpec((tile_n, d_in), lambda i: (i, 0)),     # feature tile
            resident(w1b.shape), resident(b1.shape),
            resident(w2b.shape), resident(b2.shape),
            resident(w3.shape), resident(b3.shape),
        ],
        out_specs=pl.BlockSpec((g_pad, d_out), lambda i: (0, 0)),
        out_shape=jax.ShapeDtypeStruct((g_pad, d_out), jnp.float32),
        scratch_shapes=[
            pltpu.VMEM((g_pad, h2), jnp.float32),   # per-graph sum of h2
            pltpu.VMEM((g_pad, 1), jnp.float32),    # per-graph node counts
        ],
        compiler_params=pltpu.CompilerParams(
            dimension_semantics=("arbitrary",),     # node axis accumulates
            vmem_limit_bytes=32 * 1024 * 1024,      # fits v7x (64 MiB) with headroom
        ),
    )(nb2d, feats, w1b, b1, w2b, b2, w3, b3)

    return out[:num_graphs]


def init_params(key, input_size, output_sizes):
    """Torch-Linear-style init (uniform +-1/sqrt(fan_in)) for the MLP layers."""
    sizes = [input_size] + list(output_sizes)
    params = []
    for i in range(len(sizes) - 1):
        key, kw, kb = jax.random.split(key, 3)
        bound = 1.0 / float(sizes[i]) ** 0.5
        w = jax.random.uniform(kw, (sizes[i], sizes[i + 1]), jnp.float32,
                               -bound, bound)
        b = jax.random.uniform(kb, (1, sizes[i + 1]), jnp.float32, -bound, bound)
        params += [w, b]
    return tuple(params)


def reference_forward(features, node_batch, num_graphs, params):
    """Pure-JAX reference mimicking the kernel's bf16 matmul precision."""
    w1, b1, w2, b2, w3, b3 = params

    def mm_bf16(a, b):
        return jnp.dot(a.astype(jnp.bfloat16), b.astype(jnp.bfloat16),
                       preferred_element_type=jnp.float32)

    h = jax.nn.silu(mm_bf16(features, w1) + b1)
    h = jax.nn.silu(mm_bf16(h, w2) + b2)
    e_si = jnp.dot(h, w3, preferred_element_type=jnp.float32) + b3
    return jax.ops.segment_sum(e_si, node_batch, num_segments=num_graphs)


if __name__ == "__main__":
    key = jax.random.PRNGKey(0)

    # Small shapes consistent with the module: N nodes, input_size features,
    # MLP output_sizes = [32, 32, 1] (per-node energy), num_graphs graphs.
    N = 200                      # > tile_n so the node grid is exercised (2 tiles)
    input_size = 32
    output_sizes = [32, 32, 1]
    num_graphs = 8

    k_feat, k_batch, k_param = jax.random.split(key, 3)
    features = jax.random.normal(k_feat, (N, input_size), jnp.float32)
    node_batch = jax.random.randint(k_batch, (N,), 0, num_graphs, dtype=jnp.int32)

    params = init_params(k_param, input_size, output_sizes)

    e_s = eddp_forward(features, node_batch, num_graphs, params)
    e_s = jax.block_until_ready(e_s)

    ref = reference_forward(features, node_batch, num_graphs, params)
    assert e_s.shape == (num_graphs, output_sizes[-1])
    assert jnp.allclose(e_s, ref, atol=2e-3, rtol=2e-3), (
        float(jnp.max(jnp.abs(e_s - ref))))

    print("KERNEL_OK")
</pallas_src>

<mosaic_0001>
module attributes {stable_mosaic.version = 11 : i64} {
  func.func @eddp_kernel(%arg0: i32, %arg1: memref<1x128xi32, #tpu.memory_space<vmem>>, %arg2: memref<128x32xbf16, #tpu.memory_space<vmem>>, %arg3: memref<32x32xbf16, #tpu.memory_space<vmem>>, %arg4: memref<1x32xf32, #tpu.memory_space<vmem>>, %arg5: memref<32x32xbf16, #tpu.memory_space<vmem>>, %arg6: memref<1x32xf32, #tpu.memory_space<vmem>>, %arg7: memref<32x1xf32, #tpu.memory_space<vmem>>, %arg8: memref<1x1xf32, #tpu.memory_space<vmem>>, %arg9: memref<8x1xf32, #tpu.memory_space<vmem>>, %arg10: memref<8x32xf32, #tpu.memory_space<vmem>>, %arg11: memref<8x1xf32, #tpu.memory_space<vmem>>) attributes {dimension_semantics = [#tpu.dimension_semantics<arbitrary>], iteration_bounds = array<i64: 2>, scalar_prefetch = 0 : i64, scratch_operands = 2 : i64, tpu.core_type = #tpu.core_type<tc>, window_params = [{transform_indices = @transform_0, window_bounds = array<i64: 1, 128>}, {transform_indices = @transform_1, window_bounds = array<i64: 128, 32>}, {pipeline_mode = #tpu.pipeline_mode<synchronous>, transform_indices = @transform_2, window_bounds = array<i64: 32, 32>}, {pipeline_mode = #tpu.pipeline_mode<synchronous>, transform_indices = @transform_3, window_bounds = array<i64: 1, 32>}, {pipeline_mode = #tpu.pipeline_mode<synchronous>, transform_indices = @transform_4, window_bounds = array<i64: 32, 32>}, {pipeline_mode = #tpu.pipeline_mode<synchronous>, transform_indices = @transform_5, window_bounds = array<i64: 1, 32>}, {pipeline_mode = #tpu.pipeline_mode<synchronous>, transform_indices = @transform_6, window_bounds = array<i64: 32, 1>}, {pipeline_mode = #tpu.pipeline_mode<synchronous>, transform_indices = @transform_7, window_bounds = array<i64: 1, 1>}, {pipeline_mode = #tpu.pipeline_mode<synchronous>, transform_indices = @transform_8, window_bounds = array<i64: 8, 1>}]} {
    %c0_i32 = arith.constant 0 : i32
    %0 = arith.cmpi eq, %arg0, %c0_i32 : i32
    %1 = arith.extui %0 : i1 to i32
    %c0_i32_0 = arith.constant 0 : i32
    %2 = arith.cmpi ne, %1, %c0_i32_0 : i32
    scf.if %2 {
      %cst_30 = arith.constant 0.000000e+00 : f32
      %49 = vector.broadcast %cst_30 : f32 to vector<8x32xf32>
      %c0_31 = arith.constant 0 : index
      %c0_32 = arith.constant 0 : index
      %50 = vector.load %arg10[%c0_31, %c0_32] : memref<8x32xf32, #tpu.memory_space<vmem>>, vector<8x32xf32>
      tpu.vector_store %arg10[%c0_31, %c0_32], %49 {strides = array<i32>} : memref<8x32xf32, #tpu.memory_space<vmem>>, vector<8x32xf32>,
      %cst_33 = arith.constant 0.000000e+00 : f32
      %51 = vector.broadcast %cst_33 : f32 to vector<8x1xf32>
      %c0_34 = arith.constant 0 : index
      %c0_35 = arith.constant 0 : index
      %52 = vector.load %arg11[%c0_34, %c0_35] : memref<8x1xf32, #tpu.memory_space<vmem>>, vector<8x1xf32>
      tpu.vector_store %arg11[%c0_34, %c0_35], %51 {strides = array<i32>} : memref<8x1xf32, #tpu.memory_space<vmem>>, vector<8x1xf32>,
    } else {
    }
    %c0 = arith.constant 0 : index
    %c0_1 = arith.constant 0 : index
    %3 = vector.load %arg2[%c0, %c0_1] : memref<128x32xbf16, #tpu.memory_space<vmem>>, vector<128x32xbf16>
    %c0_2 = arith.constant 0 : index
    %c0_3 = arith.constant 0 : index
    %4 = vector.load %arg3[%c0_2, %c0_3] : memref<32x32xbf16, #tpu.memory_space<vmem>>, vector<32x32xbf16>
    %cst = arith.constant dense<0.000000e+00> : vector<128x32xf32>
    %5 = tpu.matmul %3, %4, %cst {dimension_numbers = #tpu.dot_dimension_numbers<[1], [0], [0], [1], [0, 0, 1, 1], [], []>} : vector<128x32xbf16>, vector<32x32xbf16>, vector<128x32xf32> -> vector<128x32xf32>
    %c0_4 = arith.constant 0 : index
    %c0_5 = arith.constant 0 : index
    %6 = vector.load %arg4[%c0_4, %c0_5] : memref<1x32xf32, #tpu.memory_space<vmem>>, vector<1x32xf32>
    %7 = vector.broadcast %6 : vector<1x32xf32> to vector<128x32xf32>
    %8 = arith.addf %5, %7 : vector<128x32xf32>
    %cst_6 = arith.constant 0.000000e+00 : f32
    %9 = vector.broadcast %cst_6 : f32 to vector<128x32xf32>
    %10 = arith.subf %9, %8 : vector<128x32xf32>
    %11 = math.exp %10 : vector<128x32xf32>
    %cst_7 = arith.constant 1.000000e+00 : f32
    %12 = vector.broadcast %cst_7 : f32 to vector<128x32xf32>
    %13 = arith.addf %12, %11 : vector<128x32xf32>
    %cst_8 = arith.constant 1.000000e+00 : f32
    %14 = vector.broadcast %cst_8 : f32 to vector<128x32xf32>
    %15 = arith.divf %14, %13 : vector<128x32xf32>
    %16 = arith.mulf %8, %15 : vector<128x32xf32>
    %17 = arith.truncf %16 : vector<128x32xf32> to vector<128x32xbf16>
    %c0_9 = arith.constant 0 : index
    %c0_10 = arith.constant 0 : index
    %18 = vector.load %arg5[%c0_9, %c0_10] : memref<32x32xbf16, #tpu.memory_space<vmem>>, vector<32x32xbf16>
    %cst_11 = arith.constant dense<0.000000e+00> : vector<128x32xf32>
    %19 = tpu.matmul %17, %18, %cst_11 {dimension_numbers = #tpu.dot_dimension_numbers<[1], [0], [0], [1], [0, 0, 1, 1], [], []>} : vector<128x32xbf16>, vector<32x32xbf16>, vector<128x32xf32> -> vector<128x32xf32>
    %c0_12 = arith.constant 0 : index
    %c0_13 = arith.constant 0 : index
    %20 = vector.load %arg6[%c0_12, %c0_13] : memref<1x32xf32, #tpu.memory_space<vmem>>, vector<1x32xf32>
    %21 = vector.broadcast %20 : vector<1x32xf32> to vector<128x32xf32>
    %22 = arith.addf %19, %21 : vector<128x32xf32>
    %cst_14 = arith.constant 0.000000e+00 : f32
    %23 = vector.broadcast %cst_14 : f32 to vector<128x32xf32>
    %24 = arith.subf %23, %22 : vector<128x32xf32>
    %25 = math.exp %24 : vector<128x32xf32>
    %cst_15 = arith.constant 1.000000e+00 : f32
    %26 = vector.broadcast %cst_15 : f32 to vector<128x32xf32>
    %27 = arith.addf %26, %25 : vector<128x32xf32>
    %cst_16 = arith.constant 1.000000e+00 : f32
    %28 = vector.broadcast %cst_16 : f32 to vector<128x32xf32>
    %29 = arith.divf %28, %27 : vector<128x32xf32>
    %30 = arith.mulf %22, %29 : vector<128x32xf32>
    %c0_17 = arith.constant 0 : index
    %c0_18 = arith.constant 0 : index
    %31 = vector.load %arg1[%c0_17, %c0_18] : memref<1x128xi32, #tpu.memory_space<vmem>>, vector<1x128xi32>
    %32 = tpu.iota {dimensions = array<i32: 0>} : vector<8x128xi32>
    %33 = vector.broadcast %31 : vector<1x128xi32> to vector<8x128xi32>
    %34 = arith.cmpi eq, %32, %33 : vector<8x128xi32>
    %35 = arith.extui %34 : vector<8x128xi1> to vector<8x128xi32>
    %36 = arith.sitofp %35 : vector<8x128xi32> to vector<8x128xf32>
    %c0_19 = arith.constant 0 : index
    %c0_20 = arith.constant 0 : index
    %37 = vector.load %arg10[%c0_19, %c0_20] : memref<8x32xf32, #tpu.memory_space<vmem>>, vector<8x32xf32>
    %cst_21 = arith.constant dense<0.000000e+00> : vector<8x32xf32>
    %38 = tpu.matmul %36, %30, %cst_21 {dimension_numbers = #tpu.dot_dimension_numbers<[1], [0], [0], [1], [0, 0, 1, 1], [], []>} : vector<8x128xf32>, vector<128x32xf32>, vector<8x32xf32> -> vector<8x32xf32>
    %39 = arith.addf %37, %38 : vector<8x32xf32>
    %c0_22 = arith.constant 0 : index
    %c0_23 = arith.constant 0 : index
    %40 = vector.load %arg10[%c0_22, %c0_23] : memref<8x32xf32, #tpu.memory_space<vmem>>, vector<8x32xf32>
    tpu.vector_store %arg10[%c0_22, %c0_23], %39 {strides = array<i32>} : memref<8x32xf32, #tpu.memory_space<vmem>>, vector<8x32xf32>,
    %c0_24 = arith.constant 0 : index
    %c0_25 = arith.constant 0 : index
    %41 = vector.load %arg11[%c0_24, %c0_25] : memref<8x1xf32, #tpu.memory_space<vmem>>, vector<8x1xf32>
    %cst_26 = arith.constant dense<0.000000e+00> : vector<8xf32>
    %42 = vector.multi_reduction <add>, %36, %cst_26 [1] : vector<8x128xf32> to vector<8xf32>
    %43 = vector.shape_cast %42 : vector<8xf32> to vector<8x1xf32>
    %44 = arith.addf %41, %43 : vector<8x1xf32>
    %c0_27 = arith.constant 0 : index
    %c0_28 = arith.constant 0 : index
    %45 = vector.load %arg11[%c0_27, %c0_28] : memref<8x1xf32, #tpu.memory_space<vmem>>, vector<8x1xf32>
    tpu.vector_store %arg11[%c0_27, %c0_28], %44 {strides = array<i32>} : memref<8x1xf32, #tpu.memory_space<vmem>>, vector<8x1xf32>,
    %c1_i32 = arith.constant 1 : i32
    %46 = arith.cmpi eq, %arg0, %c1_i32 : i32
    %47 = arith.extui %46 : i1 to i32
    %c0_i32_29 = arith.constant 0 : i32
    %48 = arith.cmpi ne, %47, %c0_i32_29 : i32
    scf.if %48 {
      %c0_30 = arith.constant 0 : index
      %c0_31 = arith.constant 0 : index
      %49 = vector.load %arg10[%c0_30, %c0_31] : memref<8x32xf32, #tpu.memory_space<vmem>>, vector<8x32xf32>
      %c0_32 = arith.constant 0 : index
      %c0_33 = arith.constant 0 : index
      %50 = vector.load %arg7[%c0_32, %c0_33] : memref<32x1xf32, #tpu.memory_space<vmem>>, vector<32x1xf32>
      %cst_34 = arith.constant dense<0.000000e+00> : vector<8x1xf32>
      %51 = tpu.matmul %49, %50, %cst_34 {dimension_numbers = #tpu.dot_dimension_numbers<[1], [0], [0], [1], [0, 0, 1, 1], [], []>} : vector<8x32xf32>, vector<32x1xf32>, vector<8x1xf32> -> vector<8x1xf32>
      %c0_35 = arith.constant 0 : index
      %c0_36 = arith.constant 0 : index
      %52 = vector.load %arg11[%c0_35, %c0_36] : memref<8x1xf32, #tpu.memory_space<vmem>>, vector<8x1xf32>
      %c0_37 = arith.constant 0 : index
      %c0_38 = arith.constant 0 : index
      %53 = vector.load %arg8[%c0_37, %c0_38] : memref<1x1xf32, #tpu.memory_space<vmem>>, vector<1x1xf32>
      %54 = vector.broadcast %53 : vector<1x1xf32> to vector<8x1xf32>
      %55 = arith.mulf %52, %54 : vector<8x1xf32>
      %56 = arith.addf %51, %55 : vector<8x1xf32>
      %c0_39 = arith.constant 0 : index
      %c0_40 = arith.constant 0 : index
      %57 = vector.load %arg9[%c0_39, %c0_40] : memref<8x1xf32, #tpu.memory_space<vmem>>, vector<8x1xf32>
      tpu.vector_store %arg9[%c0_39, %c0_40], %56 {strides = array<i32>} : memref<8x1xf32, #tpu.memory_space<vmem>>, vector<8x1xf32>,
    } else {
    }
    return
  }
  func.func @transform_0(%arg0: i32) -> (i32, i32) {
    %c0_i32 = arith.constant 0 : i32
    %c0_i32_0 = arith.constant 0 : i32
    return %c0_i32, %arg0 : i32, i32
  }
  func.func @transform_1(%arg0: i32) -> (i32, i32) {
    %c0_i32 = arith.constant 0 : i32
    %c0_i32_0 = arith.constant 0 : i32
    return %arg0, %c0_i32 : i32, i32
  }
  func.func @transform_2(%arg0: i32) -> (i32, i32) {
    %c0_i32 = arith.constant 0 : i32
    %c0_i32_0 = arith.constant 0 : i32
    %c0_i32_1 = arith.constant 0 : i32
    return %c0_i32, %c0_i32_0 : i32, i32
  }
  func.func @transform_3(%arg0: i32) -> (i32, i32) {
    %c0_i32 = arith.constant 0 : i32
    %c0_i32_0 = arith.constant 0 : i32
    %c0_i32_1 = arith.constant 0 : i32
    return %c0_i32, %c0_i32_0 : i32, i32
  }
  func.func @transform_4(%arg0: i32) -> (i32, i32) {
    %c0_i32 = arith.constant 0 : i32
    %c0_i32_0 = arith.constant 0 : i32
    %c0_i32_1 = arith.constant 0 : i32
    return %c0_i32, %c0_i32_0 : i32, i32
  }
  func.func @transform_5(%arg0: i32) -> (i32, i32) {
    %c0_i32 = arith.constant 0 : i32
    %c0_i32_0 = arith.constant 0 : i32
    %c0_i32_1 = arith.constant 0 : i32
    return %c0_i32, %c0_i32_0 : i32, i32
  }
  func.func @transform_6(%arg0: i32) -> (i32, i32) {
    %c0_i32 = arith.constant 0 : i32
    %c0_i32_0 = arith.constant 0 : i32
    %c0_i32_1 = arith.constant 0 : i32
    return %c0_i32, %c0_i32_0 : i32, i32
  }
  func.func @transform_7(%arg0: i32) -> (i32, i32) {
    %c0_i32 = arith.constant 0 : i32
    %c0_i32_0 = arith.constant 0 : i32
    %c0_i32_1 = arith.constant 0 : i32
    return %c0_i32, %c0_i32_0 : i32, i32
  }
  func.func @transform_8(%arg0: i32) -> (i32, i32) {
    %c0_i32 = arith.constant 0 : i32
    %c0_i32_0 = arith.constant 0 : i32
    %c0_i32_1 = arith.constant 0 : i32
    return %c0_i32, %c0_i32_0 : i32, i32
  }
}

</mosaic_0001>

<bundles_post_ra>
// kernel: tpu_custom_call.1
= control target key start
LH: loop header
LB: loop body
LE: loop exit
PB: predicated region body
PF: predicated region fallthrough
CT: control target
= control target key end

     0   :  { %s1536_s29 = smov 0   ;;  %s1805_s0 = inlined_call_operand.vmem [shape: s32[1,256], index: 0, kind: input, shape index: {}]   ;;  %s1806_s1 = inlined_call_operand.vmem [shape: bf16[256,32], index: 1, kind: input, shape index: {}]   ;;  %s1807_s2 = inlined_call_operand.vmem [shape: bf16[32,32], index: 2, kind: input, shape index: {}]   ;;  %s1808_s3 = inlined_call_operand.vmem [shape: f32[1,32], index: 3, kind: input, shape index: {}]   ;;  %s1809_s4 = inlined_call_operand.vmem [shape: bf16[32,32], index: 4, kind: input, shape index: {}]   ;;  %s1810_s5 = inlined_call_operand.vmem [shape: f32[1,32], index: 5, kind: input, shape index: {}]   ;;  %s1811_s6 = inlined_call_operand.vmem [shape: f32[32,1], index: 6, kind: input, shape index: {}]   ;;  %s1812_s7 = inlined_call_operand.<no memory space> [shape: f32[1,1], index: 7, kind: input, shape index: {}]   ;;  %s1813_s8 = inlined_call_operand.vmem [shape: f32[8,1], index: 8, kind: output, shape index: {}]  }
   0x1   :  { %v13_v0 = vstv %s1812_s7 }
   0x2   :  { %14 = vst [vmem:[#allocation4] sm:$0x1] %v13_v0 }
   0x3 LB: > { %s1542_s30 = sadd.s32 4294967295, %s1478_s29   ;;  %p1116_p0 = scmp.ge.s32.totalorder %s1478_s29, 1  ;;  %s1478_s29 = sphi %s1536_s29, %s20_s29  }
   0x4   : > { %p268_p1 = scmp.lt.s32.totalorder %s1478_s29, 3 }
   0x6   : > { %p269_p2 = pnand %p1116_p0, %p268_p1 }
   0x7   : > { %p300_p3 = scmp.lt.s32.totalorder (!%p269_p2), %s1542_s30, 1  ;;  %s1117_s7 = sshll.u32 (!%p269_p2), %s1542_s30, 4 }
   0x8   : > { %272 = sbr.rel (%p269_p2) target bundleno = 1000 (0x3e8), region = 52  ;;  %p304_p4 = scmp.lt.s32.totalorder (!%p269_p2), %s1117_s7, 31 }
   0x9   : > { %p1119_p5 = scmp.ne.s32.totalorder (!%p269_p2), %s1542_s30, 0 }
   0xf   : > { %s1549_s9 = scalar_select %p300_p3, %s1542_s30, 1 }
  0x10   : > { %s1815_s7 = smov (!%p304_p4, %s1117_s7), 31  ;;  %313 = sbr.rel (%p1119_p5) target bundleno = 23 (0x17), region = 56 }
  0x11   : > { %s302_s12 = scalar_lea.vmem %s1805_s0, %s1549_s9  ;;  %s1118_s13 = sshll.u32 %s1815_s7, 2  ;;  %vm314_vm0 = vcmask (!%p1119_p5), 261120   ;;  %vm316_vm1 = vcmask (!%p1119_p5), 7168   ;;  %v1480_v1 = vmov (!%p1119_p5), 0.0  }
  0x12   : > { %s307_s16 = scalar_lea.vmem %s1806_s1, %s1118_s13  ;;  %315 = vst.msk [vmem:[#allocation2] sm:$0xff] (!%p1119_p5), %vm314_vm0, %v1480_v1 }
  0x13   : > { %317 = vst.msk [vmem:[#allocation3] sm:$0xff] (!%p1119_p5), %vm316_vm1, %v1480_v1 }
  0x17 PF: > { %v1332_v2 = vld [vmem:[%s1807_s2] sm:$0xff]   ;;  %v1333_v3 = vld [vmem:[%s1807_s2 + $0x8] sm:$0xff]   ;;  %vm397_vm2 = vcmask 261120   ;;  %v1336_v6 = vld [vmem:[%s307_s16 + $0x10] sm:$0xff]   ;;  %vm1482_vm3 = vmmov 0   ;;  %vm982_vm5 = vcmask 7168  }
  0x18   : > { %1200 = vmatprep.subr.bf16.mxu0 %v1332_v2  ;;  %v1334_v4 = vld [vmem:[%s307_s16] sm:$0xff]   ;;  %v1335_v5 = vld [vmem:[%s307_s16 + $0x8] sm:$0xff]   ;;  %v1337_v7 = vld [vmem:[%s307_s16 + $0x18] sm:$0xff]   ;;  %p1153_p6 = scmp.ne.s32.totalorder %s1542_s30, 1 }
  0x19   : > { %1201 = vmatpush3.bf16.msra.mxu0 %v1332_v2  ;;  %1204 = vmatprep.mubr.msk.bf16.mxu0 %vm397_vm2, %v1334_v4  ;;  %v1338_v8 = vld [vmem:[%s307_s16 + $0x20] sm:$0xff]   ;;  %v1339_v9 = vld [vmem:[%s307_s16 + $0x28] sm:$0xff]   ;;  %v1340_v10 = vld [vmem:[%s307_s16 + $0x30] sm:$0xff]   ;;  %vm1486_vm6 = vmmov (!%p1153_p6), 0  }
  0x1a   : > { %1202 = vmatprep.subr.bf16.mxu0 %v1333_v3  ;;  %v1341_v11 = vld [vmem:[%s307_s16 + $0x38] sm:$0xff]   ;;  %v1342_v12 = vld [vmem:[%s1809_s4] sm:$0xff]   ;;  %v1343_v13 = vld [vmem:[%s1809_s4 + $0x8] sm:$0xff]  }
  0x1b   : > { %1220 = vmatprep.subr.bf16.mxu1 %v1342_v12  ;;  %v1582_v14 = vld [vmem:[%s1808_s3] ss:$0 sm:$0xff] }
  0x1c   : > { %1221 = vmatpush3.bf16.msra.mxu1 %v1342_v12 }
  0x1d   : > { %1203 = vmatpush3.bf16.msra.mxu0 %v1333_v3  ;;  %1222 = vmatprep.subr.bf16.mxu1 %v1343_v13 }
  0x20   : > { %1205 = vmatmul.mubr.msk.bf16.vlgmr.msra.gmra.mrb[0].mxu0 %vm397_vm2, %v1335_v5  ;;  %1223 = vmatpush3.bf16.msra.mxu1 %v1343_v13 }
  0x21   : > { %1208 = vmatprep.mubr.msk.bf16.mxu0 %vm397_vm2, %v1336_v6 }
  0x28   : > { %1209 = vmatmul.mubr.msk.bf16.gmra.mrb[4].mxu0 %vm397_vm2, %v1337_v7 }
  0x29   : > { %1212 = vmatprep.mubr.msk.bf16.mxu0 %vm397_vm2, %v1338_v8 }
  0x30   : > { %1213 = vmatmul.mubr.msk.bf16.gmra.mrb[8].mxu0 %vm397_vm2, %v1339_v9 }
  0x31   : > { %1216 = vmatprep.mubr.msk.bf16.mxu0 %vm397_vm2, %v1340_v10 }
  0x38   : > { %1217 = vmatmul.mubr.msk.bf16.gmra.mrb[12].mxu0 %vm397_vm2, %v1341_v11 }
  0xf3   : > { %v1206_v15 = vpop.f32.mrb[0].mxu0 }
  0xf4   : > { %v1585_v16 = vadd.f32 %v1206_v15, %v1582_v14  ;;  %v456_v17 = vpop.f32.mrb[1].mxu0 }
  0xf5   : > { %v1588_v18 = vadd.f32 %v1582_v14, %v456_v17  ;;  %v1207_v19 = vpop.f32.mrb[2].mxu0 }
  0xf6   : > { %v521_v20 = vsub.f32 0.0, %v1585_v16  ;;  %v1592_v21 = vadd.f32 %v1207_v19, %v1582_v14  ;;  %v459_v22 = vpop.f32.mrb[3].mxu0 }
  0xf7   : > { %v519_v23 = vsub.f32 0.0, %v1588_v18  ;;  %v1596_v24 = vadd.f32 %v1582_v14, %v459_v22 }
  0xf8   : > { %v539_v25 = vmul.f32 1.442695, %v521_v20  ;;  %v522_v26 = vsub.f32 0.0, %v1592_v21 }
  0xf9   : > { %v535_v27 = vmul.f32 1.442695, %v519_v23  ;;  %v520_v28 = vsub.f32 0.0, %v1596_v24 }
  0xfa   : > { %1344 = vpow2.f32 %v539_v25  ;;  %v541_v29 = vmul.f32 1.442695, %v522_v26 }
  0xfb   : > { %1346 = vpow2.f32 %v535_v27  ;;  %v537_v30 = vmul.f32 1.442695, %v520_v28  ;;  %v1210_v31 = vpop.f32.mrb[4].mxu0 }
  0xfc   : > { %1348 = vpow2.f32 %v541_v29  ;;  %v1601_v32 = vadd.f32 %v1210_v31, %v1582_v14  ;;  %v472_v33 = vpop.f32.mrb[5].mxu0 }
  0xfd   : > { %1350 = vpow2.f32 %v537_v30  ;;  %v1604_v34 = vadd.f32 %v1582_v14, %v472_v33  ;;  %v1211_v35 = vpop.f32.mrb[6].mxu0 }
  0xfe   : > { %v525_v36 = vsub.f32 0.0, %v1601_v32  ;;  %v1608_v37 = vadd.f32 %v1211_v35, %v1582_v14  ;;  %v475_v38 = vpop.f32.mrb[7].mxu0 }
  0xff   : > { %v523_v39 = vsub.f32 0.0, %v1604_v34  ;;  %v1612_v40 = vadd.f32 %v1582_v14, %v475_v38 }
 0x100   : > { %v547_v41 = vmul.f32 1.442695, %v525_v36  ;;  %v526_v42 = vsub.f32 0.0, %v1608_v37 }
 0x101   : > { %v543_v43 = vmul.f32 1.442695, %v523_v39  ;;  %v524_v44 = vsub.f32 0.0, %v1612_v40 }
 0x102   : > { %1352 = vpow2.f32 %v547_v41  ;;  %v549_v45 = vmul.f32 1.442695, %v526_v42 }
 0x103   : > { %1354 = vpow2.f32 %v543_v43  ;;  %v545_v46 = vmul.f32 1.442695, %v524_v44  ;;  %v1214_v47 = vpop.f32.mrb[8].mxu0 }
 0x104   : > { %v1345_v48 = vpop.eup %1344  ;;  %1356 = vpow2.f32 %v549_v45  ;;  %v1617_v49 = vadd.f32 %v1214_v47, %v1582_v14  ;;  %v488_v50 = vpop.f32.mrb[9].mxu0 }
 0x105   : > { %v1347_v51 = vpop.eup %1346  ;;  %v569_v52 = vadd.f32 1.0, %v1345_v48  ;;  %1358 = vpow2.f32 %v545_v46  ;;  %v1620_v53 = vadd.f32 %v1582_v14, %v488_v50  ;;  %v1215_v54 = vpop.f32.mrb[10].mxu0 }
 0x106   : > { %v1349_v55 = vpop.eup %1348  ;;  %v567_v56 = vadd.f32 1.0, %v1347_v51  ;;  %v529_v57 = vsub.f32 0.0, %v1617_v49  ;;  %v1624_v58 = vadd.f32 %v1215_v54, %v1582_v14  ;;  %v491_v59 = vpop.f32.mrb[11].mxu0 }
 0x107   : > { %v1351_v60 = vpop.eup %1350  ;;  %1360 = vrcp.f32 %v569_v52  ;;  %v570_v61 = vadd.f32 1.0, %v1349_v55  ;;  %v527_v62 = vsub.f32 0.0, %v1620_v53  ;;  %v1628_v63 = vadd.f32 %v1582_v14, %v491_v59 }
 0x108   : > { %1362 = vrcp.f32 %v567_v56  ;;  %v568_v0 = vadd.f32 1.0, %v1351_v60  ;;  %v555_v1 = vmul.f32 1.442695, %v529_v57  ;;  %v530_v2 = vsub.f32 0.0, %v1624_v58 }
 0x109   : > { %1364 = vrcp.f32 %v570_v61  ;;  %v551_v3 = vmul.f32 1.442695, %v527_v62  ;;  %v528_v4 = vsub.f32 0.0, %v1628_v63 }
 0x10a   : > { %1366 = vrcp.f32 %v568_v0  ;;  %v557_v5 = vmul.f32 1.442695, %v530_v2 }
 0x10b   : > { %1368 = vpow2.f32 %v555_v1  ;;  %v553_v6 = vmul.f32 1.442695, %v528_v4  ;;  %v1218_v7 = vpop.f32.mrb[12].mxu0 }
 0x10c   : > { %v1353_v8 = vpop.eup %1352  ;;  %1370 = vpow2.f32 %v551_v3  ;;  %v1633_v9 = vadd.f32 %v1218_v7, %v1582_v14  ;;  %v504_v10 = vpop.f32.mrb[13].mxu0 }
 0x10d   : > { %v1355_v11 = vpop.eup %1354  ;;  %v573_v12 = vadd.f32 1.0, %v1353_v8  ;;  %1372 = vpow2.f32 %v557_v5  ;;  %v1636_v13 = vadd.f32 %v1582_v14, %v504_v10  ;;  %v1219_v15 = vpop.f32.mrb[14].mxu0 }
 0x10e   : > { %v1357_v17 = vpop.eup %1356  ;;  %v571_v19 = vadd.f32 1.0, %v1355_v11  ;;  %1374 = vpow2.f32 %v553_v6  ;;  %v533_v20 = vsub.f32 0.0, %v1633_v9  ;;  %v1640_v22 = vadd.f32 %v1219_v15, %v1582_v14  ;;  %v507_v23 = vpop.f32.mrb[15].mxu0 }
 0x10f   : > { %v1359_v25 = vpop.eup %1358  ;;  %1376 = vrcp.f32 %v573_v12  ;;  %v574_v26 = vadd.f32 1.0, %v1357_v17  ;;  %v531_v27 = vsub.f32 0.0, %v1636_v13  ;;  %v1644_v28 = vadd.f32 %v1582_v14, %v507_v23 }
 0x110   : > { %1378 = vrcp.f32 %v571_v19  ;;  %v572_v29 = vadd.f32 1.0, %v1359_v25  ;;  %v563_v30 = vmul.f32 1.442695, %v533_v20  ;;  %v534_v31 = vsub.f32 0.0, %v1640_v22 }
 0x111   : > { %v1361_v33 = vpop.eup %1360  ;;  %1380 = vrcp.f32 %v574_v26  ;;  %v559_v35 = vmul.f32 1.442695, %v531_v27  ;;  %v532_v36 = vsub.f32 0.0, %v1644_v28 }
 0x112   : > { %v1363_v38 = vpop.eup %1362  ;;  %1382 = vrcp.f32 %v572_v29  ;;  %v565_v39 = vmul.f32 1.442695, %v534_v31  ;;  %v617_v14 = vmul.f32 %v1361_v33, %v1585_v16  ;;  %v1481_v33 = vmov 0.0|0.0  }
 0x113   : > { %v1365_v41 = vpop.eup %1364  ;;  %1384 = vpow2.f32 %v563_v30  ;;  %v561_v42 = vmul.f32 1.442695, %v532_v36  ;;  %v615_v46 = vmul.f32 %v1363_v38, %v1588_v18  ;;  %1286 = vmatprep.subr.bf16.mxu0 %v1481_v33  ;;  %v1690_v36 = vld [vmem:[%s1810_s5] ss:$0 sm:$0xff] }
 0x114   : > { %v1367_v43 = vpop.eup %1366  ;;  %v618_v44 = vmul.f32 %v1365_v41, %v1592_v21  ;;  %1386 = vpow2.f32 %v559_v35  ;;  %v896_v35 = vlaneseq }
 0x115   : > { %v1369_v45 = vpop.eup %1368  ;;  %v616_v47 = vmul.f32 %v1367_v43, %v1596_v24  ;;  %1388 = vpow2.f32 %v565_v39 }
 0x116   : > { %v1371_v48 = vpop.eup %1370  ;;  %v632_v50 = vpack.c.bf16 %v618_v44, %v617_v14  ;;  %v577_v51 = vadd.f32 1.0, %v1369_v45  ;;  %1390 = vpow2.f32 %v561_v42 }
 0x117   : > { %v1373_v52 = vpop.eup %1372  ;;  %v575_v54 = vadd.f32 1.0, %v1371_v48  ;;  %v631_v55 = vpack.c.bf16 %v616_v47, %v615_v46 }
 0x118   : > { %v1375_v56 = vpop.eup %1374  ;;  %1392 = vrcp.f32 %v577_v51  ;;  %v578_v57 = vadd.f32 1.0, %v1373_v52 }
 0x119   : > { %v1377_v16 = vpop.eup %1376  ;;  %1394 = vrcp.f32 %v575_v54  ;;  %v576_v21 = vadd.f32 1.0, %v1375_v56  ;;  %1224 = vmatprep.mubr.msk.bf16.mxu1 %vm397_vm2, %v631_v55 }
 0x11a   : > { %v1379_v59 = vpop.eup %1378  ;;  %1396 = vrcp.f32 %v578_v57  ;;  %1225 = vmatmul.mubr.msk.bf16.vlgmr.msra.gmra.mrb[0].mxu1 %vm397_vm2, %v632_v50  ;;  %v621_v60 = vmul.f32 %v1377_v16, %v1601_v32 }
 0x11b   : > { %v1381_v18 = vpop.eup %1380  ;;  %1398 = vrcp.f32 %v576_v21  ;;  %v619_v0 = vmul.f32 %v1379_v59, %v1604_v34 }
 0x11c   : > { %v1383_v24 = vpop.eup %1382  ;;  %v622_v61 = vmul.f32 %v1381_v18, %v1608_v37 }
 0x11d   : > { %v1385_v62 = vpop.eup %1384  ;;  %v620_v1 = vmul.f32 %v1383_v24, %v1612_v40 }
 0x11e   : > { %v1387_v2 = vpop.eup %1386  ;;  %v634_v3 = vpack.c.bf16 %v622_v61, %v621_v60  ;;  %v581_v4 = vadd.f32 1.0, %v1385_v62 }
 0x11f   : > { %v1389_v5 = vpop.eup %1388  ;;  %v633_v6 = vpack.c.bf16 %v620_v1, %v619_v0  ;;  %v579_v7 = vadd.f32 1.0, %v1387_v2 }
 0x120   : > { %v1391_v8 = vpop.eup %1390  ;;  %1400 = vrcp.f32 %v581_v4  ;;  %v582_v10 = vadd.f32 1.0, %v1389_v5 }
 0x121   : > { %1402 = vrcp.f32 %v579_v7  ;;  %v580_v11 = vadd.f32 1.0, %v1391_v8  ;;  %1228 = vmatprep.mubr.msk.bf16.mxu1 %vm397_vm2, %v633_v6 }
 0x122   : > { %v1393_v32 = vpop.eup %1392  ;;  %1404 = vrcp.f32 %v582_v10  ;;  %1229 = vmatmul.mubr.msk.bf16.gmra.mrb[4].mxu1 %vm397_vm2, %v634_v3 }
 0x123   : > { %v1395_v34 = vpop.eup %1394  ;;  %1406 = vrcp.f32 %v580_v11  ;;  %v625_v12 = vmul.f32 %v1393_v32, %v1617_v49 }
 0x124   : > { %v1397_v37 = vpop.eup %1396  ;;  %v623_v17 = vmul.f32 %v1395_v34, %v1620_v53 }
 0x125   : > { %v1399_v40 = vpop.eup %1398  ;;  %v626_v15 = vmul.f32 %v1397_v37, %v1624_v58 }
 0x126   : > { %v624_v19 = vmul.f32 %v1399_v40, %v1628_v63 }
 0x127   : > { %v636_v20 = vpack.c.bf16 %v626_v15, %v625_v12 }
 0x128   : > { %v635_v23 = vpack.c.bf16 %v624_v19, %v623_v17 }
 0x12a   : > { %v1401_v25 = vpop.eup %1400  ;;  %1232 = vmatprep.mubr.msk.bf16.mxu1 %vm397_vm2, %v635_v23 }
 0x12b   : > { %v1403_v26 = vpop.eup %1402  ;;  %1233 = vmatmul.mubr.msk.bf16.gmra.mrb[8].mxu1 %vm397_vm2, %v636_v20  ;;  %v629_v30 = vmul.f32 %v1401_v25, %v1633_v9  ;;  %v1678_v9 = vld [vmem:[%s302_s12] ss:$0 sm:$0xff] }
 0x12c   : > { %v1405_v27 = vpop.eup %1404  ;;  %v627_v58 = vmul.f32 %v1403_v26, %v1636_v13  ;;  %v1483_v13 = vmov 0.0  }
 0x12d   : > { %v1407_v29 = vpop.eup %1406  ;;  %v630_v49 = vmul.f32 %v1405_v27, %v1640_v22  ;;  %v1680_v22 = vshrl.u32 %v896_v35, 7  ;;  %1272 = vmatprep.mubr.msk.f32.mxu0 %vm1482_vm3, %v1483_v13 }
 0x12e   : > { %v628_v53 = vmul.f32 %v1407_v29, %v1644_v28 }
 0x12f   : > { %v638_v63 = vpack.c.bf16 %v630_v49, %v629_v30  ;;  %vm902_vm4 = vcmp.eq.s32.totalorder %v1680_v22, %v1678_v9  ;;  %v990_v9 = vld [vmem:[%s1811_s6 + $0x8] sm:$0xff] (!%p1153_p6)  ;;  %v991_v22 = vld [vmem:[%s1811_s6 + $0x10] sm:$0xff] (!%p1153_p6) }
 0x130   : > { %v637_v31 = vpack.c.bf16 %v628_v53, %v627_v58  ;;  %v1151_v28 = vsel %vm902_vm4, 1.0, %v1483_v13 }
 0x131   : > { %979 = vadd.xlane.f32.xlu0 %v1151_v28 }
 0x132   : > { %1236 = vmatprep.mubr.msk.bf16.mxu1 %vm397_vm2, %v637_v31 }
 0x133   : > { %1237 = vmatmul.mubr.msk.bf16.gmra.mrb[12].mxu1 %vm397_vm2, %v638_v63 }
 0x1ed   : > { %v1226_v38 = vpop.f32.mrb[0].mxu1 }
 0x1ee   : > { %v1693_v39 = vadd.f32 %v1226_v38, %v1690_v36  ;;  %v720_v41 = vpop.f32.mrb[1].mxu1 }
 0x1ef   : > { %v1696_v42 = vadd.f32 %v1690_v36, %v720_v41  ;;  %v1227_v43 = vpop.f32.mrb[2].mxu1 }
 0x1f0   : > { %v785_v14 = vsub.f32 0.0, %v1693_v39  ;;  %v1700_v44 = vadd.f32 %v1227_v43, %v1690_v36  ;;  %v723_v45 = vpop.f32.mrb[3].mxu1 }
 0x1f1   : > { %v783_v46 = vsub.f32 0.0, %v1696_v42  ;;  %v1704_v47 = vadd.f32 %v1690_v36, %v723_v45 }
 0x1f2   : > { %v803_v48 = vmul.f32 1.442695, %v785_v14  ;;  %v786_v50 = vsub.f32 0.0, %v1700_v44 }
 0x1f3   : > { %v799_v51 = vmul.f32 1.442695, %v783_v46  ;;  %v784_v52 = vsub.f32 0.0, %v1704_v47 }
 0x1f4   : > { %1408 = vpow2.f32 %v803_v48  ;;  %v805_v54 = vmul.f32 1.442695, %v786_v50 }
 0x1f5   : > { %1410 = vpow2.f32 %v799_v51  ;;  %v801_v55 = vmul.f32 1.442695, %v784_v52  ;;  %v1230_v56 = vpop.f32.mrb[4].mxu1 }
 0x1f6   : > { %1412 = vpow2.f32 %v805_v54  ;;  %v1709_v57 = vadd.f32 %v1230_v56, %v1690_v36  ;;  %v736_v16 = vpop.f32.mrb[5].mxu1 }
 0x1f7   : > { %1414 = vpow2.f32 %v801_v55  ;;  %v1712_v21 = vadd.f32 %v1690_v36, %v736_v16  ;;  %v1231_v59 = vpop.f32.mrb[6].mxu1 }
 0x1f8   : > { %v789_v18 = vsub.f32 0.0, %v1709_v57  ;;  %v1716_v24 = vadd.f32 %v1231_v59, %v1690_v36  ;;  %v739_v60 = vpop.f32.mrb[7].mxu1 }
 0x1f9   : > { %v787_v61 = vsub.f32 0.0, %v1712_v21  ;;  %v1720_v62 = vadd.f32 %v1690_v36, %v739_v60 }
 0x1fa   : > { %v811_v0 = vmul.f32 1.442695, %v789_v18  ;;  %v790_v1 = vsub.f32 0.0, %v1716_v24 }
 0x1fb   : > { %v807_v2 = vmul.f32 1.442695, %v787_v61  ;;  %v788_v3 = vsub.f32 0.0, %v1720_v62 }
 0x1fc   : > { %1416 = vpow2.f32 %v811_v0  ;;  %v813_v4 = vmul.f32 1.442695, %v790_v1 }
 0x1fd   : > { %1418 = vpow2.f32 %v807_v2  ;;  %v809_v5 = vmul.f32 1.442695, %v788_v3 }
 0x1fe   : > { %v1409_v6 = vpop.eup %1408  ;;  %1420 = vpow2.f32 %v813_v4  ;;  %v1234_v7 = vpop.f32.mrb[8].mxu1 }
 0x1ff   : > { %v1411_v8 = vpop.eup %1410  ;;  %v833_v10 = vadd.f32 1.0, %v1409_v6  ;;  %1422 = vpow2.f32 %v809_v5  ;;  %v1725_v11 = vadd.f32 %v1234_v7, %v1690_v36  ;;  %v752_v32 = vpop.f32.mrb[9].mxu1 }
 0x200   : > { %v1413_v34 = vpop.eup %1412  ;;  %v831_v37 = vadd.f32 1.0, %v1411_v8  ;;  %v1728_v40 = vadd.f32 %v1690_v36, %v752_v32  ;;  %v1235_v12 = vpop.f32.mrb[10].mxu1 }
 0x201   : > { %v1415_v15 = vpop.eup %1414  ;;  %1424 = vrcp.f32 %v833_v10  ;;  %v834_v17 = vadd.f32 1.0, %v1413_v34  ;;  %v793_v19 = vsub.f32 0.0, %v1725_v11  ;;  %v1732_v20 = vadd.f32 %v1235_v12, %v1690_v36  ;;  %v755_v23 = vpop.f32.mrb[11].mxu1 }
 0x202   : > { %1426 = vrcp.f32 %v831_v37  ;;  %v832_v25 = vadd.f32 1.0, %v1415_v15  ;;  %v791_v26 = vsub.f32 0.0, %v1728_v40  ;;  %v1736_v27 = vadd.f32 %v1690_v36, %v755_v23 }
 0x203   : > { %1428 = vrcp.f32 %v834_v17  ;;  %v819_v29 = vmul.f32 1.442695, %v793_v19  ;;  %v794_v30 = vsub.f32 0.0, %v1732_v20 }
 0x204   : > { %1430 = vrcp.f32 %v832_v25  ;;  %v815_v49 = vmul.f32 1.442695, %v791_v26  ;;  %v792_v58 = vsub.f32 0.0, %v1736_v27 }
 0x205   : > { %1432 = vpow2.f32 %v819_v29  ;;  %v821_v53 = vmul.f32 1.442695, %v794_v30 }
 0x206   : > { %v1417_v63 = vpop.eup %1416  ;;  %1434 = vpow2.f32 %v815_v49  ;;  %v817_v31 = vmul.f32 1.442695, %v792_v58  ;;  %v1238_v35 = vpop.f32.mrb[12].mxu1 }
 0x207   : > { %v1419_v13 = vpop.eup %1418  ;;  %v837_v28 = vadd.f32 1.0, %v1417_v63  ;;  %1436 = vpow2.f32 %v821_v53  ;;  %v1741_v38 = vadd.f32 %v1238_v35, %v1690_v36  ;;  %v768_v41 = vpop.f32.mrb[13].mxu1 }
 0x208   : > { %v1421_v43 = vpop.eup %1420  ;;  %v835_v14 = vadd.f32 1.0, %v1419_v13  ;;  %1438 = vpow2.f32 %v817_v31  ;;  %v1744_v45 = vadd.f32 %v1690_v36, %v768_v41  ;;  %v1239_v46 = vpop.f32.mrb[14].mxu1 }
 0x209   : > { %v1423_v48 = vpop.eup %1422  ;;  %1440 = vrcp.f32 %v837_v28  ;;  %v838_v50 = vadd.f32 1.0, %v1421_v43  ;;  %v797_v51 = vsub.f32 0.0, %v1741_v38  ;;  %v1748_v52 = vadd.f32 %v1239_v46, %v1690_v36  ;;  %v771_v54 = vpop.f32.mrb[15].mxu1 }
 0x20a   : > { %1442 = vrcp.f32 %v835_v14  ;;  %v836_v55 = vadd.f32 1.0, %v1423_v48  ;;  %v795_v56 = vsub.f32 0.0, %v1744_v45  ;;  %v1752_v16 = vadd.f32 %v1690_v36, %v771_v54 }
 0x20b   : > { %v1425_v59 = vpop.eup %1424  ;;  %1444 = vrcp.f32 %v838_v50  ;;  %v827_v18 = vmul.f32 1.442695, %v797_v51  ;;  %v798_v60 = vsub.f32 0.0, %v1748_v52 }
 0x20c   : > { %v1427_v61 = vpop.eup %1426  ;;  %1446 = vrcp.f32 %v836_v55  ;;  %v823_v0 = vmul.f32 1.442695, %v795_v56  ;;  %v796_v1 = vsub.f32 0.0, %v1752_v16  ;;  %v881_v5 = vmul.f32 %v1425_v59, %v1693_v39 }
 0x20d   : > { %v1429_v2 = vpop.eup %1428  ;;  %1448 = vpow2.f32 %v827_v18  ;;  %v829_v3 = vmul.f32 1.442695, %v798_v60  ;;  %v879_v8 = vmul.f32 %v1427_v61, %v1696_v42 }
 0x20e   : > { %v1431_v4 = vpop.eup %1430  ;;  %v882_v6 = vmul.f32 %v1429_v2, %v1700_v44  ;;  %1450 = vpow2.f32 %v823_v0  ;;  %v825_v36 = vmul.f32 1.442695, %v796_v1  ;;  %v1484_v1 = vmov 1.0  }
 0x20f   : > { %v1433_v7 = vpop.eup %1432  ;;  %v880_v10 = vmul.f32 %v1431_v4, %v1704_v47  ;;  %1452 = vpow2.f32 %v829_v3 }
 0x210   : > { %v1435_v32 = vpop.eup %1434  ;;  %v1290_v34 = vpack.c.bf16 %v882_v6, %v881_v5  ;;  %v841_v37 = vadd.f32 1.0, %v1433_v7  ;;  %1454 = vpow2.f32 %v825_v36  ;;  %v1485_v5 = vmov (!%p1153_p6), 0.0|0.0   ;;  %v992_v36 = vld [vmem:[%s1811_s6 + $0x18] sm:$0xff] (!%p1153_p6) }
 0x211   : > { %v1437_v12 = vpop.eup %1436  ;;  %v1287_v15 = vpack.c.bf16 %v880_v10, %v879_v8  ;;  %v839_v17 = vadd.f32 1.0, %v1435_v32  ;;  %v1487_v7 = vmov (!%p1153_p6), 0.0   ;;  %v1314_v8 = vpack.c.bf16 (!%p1153_p6), %v992_v36, %v991_v22 }
 0x212   : > { %v1439_v19 = vpop.eup %1438  ;;  %1456 = vrcp.f32 %v841_v37  ;;  %v842_v39 = vadd.f32 1.0, %v1437_v12 }
 0x213   : > { %v1441_v23 = vpop.eup %1440  ;;  %1458 = vrcp.f32 %v839_v17  ;;  %v840_v44 = vadd.f32 1.0, %v1439_v19  ;;  %1288 = vmatpush3.bf16.msra.mxu0 %v1287_v15 }
 0x214   : > { %v1443_v25 = vpop.eup %1442  ;;  %1460 = vrcp.f32 %v842_v39  ;;  %1289 = vmatprep.subr.bf16.mxu0 %v1481_v33  ;;  %v885_v26 = vmul.f32 %v1441_v23, %v1709_v57 }
 0x215   : > { %v1445_v42 = vpop.eup %1444  ;;  %1462 = vrcp.f32 %v840_v44  ;;  %v883_v49 = vmul.f32 %v1443_v25, %v1712_v21 }
 0x216   : > { %v1447_v47 = vpop.eup %1446  ;;  %v886_v29 = vmul.f32 %v1445_v42, %v1716_v24 }
 0x217   : > { %v1449_v30 = vpop.eup %1448  ;;  %v884_v58 = vmul.f32 %v1447_v47, %v1720_v62  ;;  %1291 = vmatpush3.bf16.msra.mxu0 %v1290_v34  ;;  %v1154_v34 = vld [vmem:[#allocation4] ss:$0 sm:$0xff] (!%p1153_p6) }
 0x218   : > { %v1451_v53 = vpop.eup %1450  ;;  %v1296_v63 = vpack.c.bf16 %v886_v29, %v885_v26  ;;  %v845_v31 = vadd.f32 1.0, %v1449_v30  ;;  %1292 = vmatprep.subr.bf16.mxu0 %v1481_v33 }
 0x219   : > { %v1453_v35 = vpop.eup %1452  ;;  %v1293_v13 = vpack.c.bf16 %v884_v58, %v883_v49  ;;  %v843_v28 = vadd.f32 1.0, %v1451_v53 }
 0x21a   : > { %v1455_v41 = vpop.eup %1454  ;;  %1464 = vrcp.f32 %v845_v31  ;;  %v846_v43 = vadd.f32 1.0, %v1453_v35 }
 0x21b   : > { %1466 = vrcp.f32 %v843_v28  ;;  %v844_v57 = vadd.f32 1.0, %v1455_v41  ;;  %1294 = vmatpush3.bf16.msra.mxu0 %v1293_v13 }
 0x21c   : > { %v1457_v24 = vpop.eup %1456  ;;  %1468 = vrcp.f32 %v846_v43  ;;  %1295 = vmatprep.subr.bf16.mxu0 %v1481_v33 }
 0x21d   : > { %v1459_v21 = vpop.eup %1458  ;;  %1470 = vrcp.f32 %v844_v57  ;;  %v889_v46 = vmul.f32 %v1457_v24, %v1725_v11 }
 0x21e   : > { %v1461_v62 = vpop.eup %1460  ;;  %v887_v50 = vmul.f32 %v1459_v21, %v1728_v40 }
 0x21f   : > { %v1463_v14 = vpop.eup %1462  ;;  %v890_v48 = vmul.f32 %v1461_v62, %v1732_v20  ;;  %1297 = vmatpush3.bf16.msra.mxu0 %v1296_v63 }
 0x220   : > { %v888_v51 = vmul.f32 %v1463_v14, %v1736_v27  ;;  %1298 = vmatprep.subr.bf16.mxu0 %v1481_v33 }
 0x221   : > { %v1302_v54 = vpack.c.bf16 %v890_v48, %v889_v46 }
 0x222   : > { %v1299_v55 = vpack.c.bf16 %v888_v51, %v887_v50 }
 0x224   : > { %v1465_v56 = vpop.eup %1464  ;;  %1300 = vmatpush3.bf16.msra.mxu0 %v1299_v55 }
 0x225   : > { %v1467_v59 = vpop.eup %1466  ;;  %1301 = vmatprep.subr.bf16.mxu0 %v1481_v33  ;;  %v893_v11 = vmul.f32 %v1465_v56, %v1741_v38  ;;  %v978_v38 = vld [vmem:[#allocation3] sm:$0xff] }
 0x226   : > { %v1469_v18 = vpop.eup %1468  ;;  %v891_v61 = vmul.f32 %v1467_v59, %v1744_v45  ;;  %v905_v45 = vld [vmem:[#allocation2] sm:$0xff] }
 0x227   : > { %v1471_v60 = vpop.eup %1470  ;;  %v894_v20 = vmul.f32 %v1469_v18, %v1748_v52  ;;  %v980_v52 = vpop.xlane.xlu0 %979 }
 0x228   : > { %v892_v40 = vmul.f32 %v1471_v60, %v1752_v16  ;;  %1303 = vmatpush3.bf16.msra.mxu0 %v1302_v54  ;;  %v981_v2 = vadd.f32 %v980_v52, %v978_v38 }
 0x229   : > { %v1308_v27 = vpack.c.bf16 %v894_v20, %v893_v11  ;;  %1304 = vmatprep.subr.bf16.mxu0 %v1481_v33 }
 0x22a   : > { %v1305_v0 = vpack.c.bf16 %v892_v40, %v891_v61  ;;  %983 = vst.msk [vmem:[#allocation3] sm:$0xff] %vm982_vm5, %v981_v2 }
 0x22c   : > { %1306 = vmatpush3.bf16.msra.mxu0 %v1305_v0 }
 0x22d   : > { %1307 = vmatprep.subr.bf16.mxu0 %v1481_v33  ;;  %v989_v33 = vld [vmem:[%s1811_s6] sm:$0xff] (!%p1153_p6) }
 0x22e   : > { %v1311_v6 = vpack.c.bf16 (!%p1153_p6), %v990_v9, %v989_v33 }
 0x230   : > { %1309 = vmatpush3.bf16.msra.mxu0 %v1308_v27 }
 0x231   : > { %1310 = vmatprep.subr.bf16.mxu0 (!%p1153_p6), %v1485_v5  ;;  %v993_v32 = vld [vmem:[#allocation3] sm:$0xff] (!%p1153_p6) }
 0x232   : > { %v1001_v37 = vmul.f32 (!%p1153_p6), %v1154_v34, %v993_v32 }
 0x233   : > { %1273 = vmatmul.mubr.msk.f32.vlgmr.msra.gmra.mrb[16].mxu0 %vm902_vm4, %v1484_v1 }
 0x234   : > { %1283 = vmatprep.mubr.msk.f32.mxu0 (!%p1153_p6), %vm1486_vm6, %v1487_v7  ;;  %1312 = vmatpush3.bf16.msra.mxu0 (!%p1153_p6), %v1311_v6 }
 0x235   : > { %1313 = vmatprep.subr.bf16.mxu0 (!%p1153_p6), %v1485_v5 }
 0x238   : > { %1315 = vmatpush3.bf16.msra.mxu0 (!%p1153_p6), %v1314_v8 }
 0x303   : > { %987 = sbr.rel (%p1153_p6) target bundleno = 1000 (0x3e8), region = 60 }
 0x306   : > { %v972_v16 = vpop.f32.mrb[16].mxu0 }
 0x307   : > { %v976_v3 = vadd.f32 %v972_v16, %v905_v45  ;;  %v1274_v4 = vpop.f32.mrb[17].mxu0 }
 0x309   : > { %977 = vst.msk [vmem:[#allocation2] sm:$0xff] %vm397_vm2, %v976_v3 }
 0x310   : > { %v988_v10 = vld [vmem:[#allocation2] sm:$0xff] }
 0x311   : > { %1284 = vmatmul.mubr.msk.f32.vlgmr.msra.gmra.mrb[0].mxu0 %vm397_vm2, %v988_v10 }
 0x3e4   : > { %v1071_v12 = vpop.f32.mrb[0].mxu0 }
 0x3e5   : > { %v1072_v15 = vadd.f32 %v1071_v12, %v1001_v37  ;;  %v1285_v17 = vpop.f32.mrb[1].mxu0 }
 0x3e7   : > { %1075 = vst.msk [vmem:[%s1813_s8] sm:$0xff] %vm982_vm5, %v1072_v15 }
 0x3e8 PF: > { %s20_s29 = sadd.s32 1, %s1478_s29  }
 0x3e9   : > { %p17_p7 = scmp.ge.s32.totalorder %s20_s29, 4  }
 0x3eb   :  { %19 = sbr.rel (!%p17_p7) target bundleno = 3 (0x3), region = 89 }

</bundles_post_ra>
